<compile_context>
chip_gen: v7x
topology: tpu7x:2x2x1
jax: 0.10.0
libtpu: 0.0.40
codegen_flags: <defaults>
</compile_context>

<pallas_src>
import functools

import jax
import jax.numpy as jnp
from jax.experimental import pallas as pl
from jax.experimental.pallas import tpu as pltpu


def _round_up(x, m):
    return -(-x // m) * m


def _complex_kernel(q_ref, et_ref, out_ref):
    # q_ref   : (Bp, 2D)  fused query block  [a | b]           (bf16)
    # et_ref  : (2D, tn)  fused transposed entity tile [Er;Ei] (bf16)
    # out_ref : (Bp, tn)  sigmoid scores for this entity tile  (f32)
    logits = jnp.dot(q_ref[...], et_ref[...],
                     preferred_element_type=jnp.float32)
    out_ref[...] = jax.nn.sigmoid(logits)


def prepare_complex_tables(emb_e_real, emb_e_img, *, tn=8192,
                           table_dtype=jnp.bfloat16):
    """One-time (init / post-weight-update) cache of the fused, transposed,
    padded entity table.  Returns (e_cat_t, tn_eff) where
    e_cat_t has shape (2D, Np), Np a multiple of tn_eff."""
    N, D = emb_e_real.shape
    Np128 = _round_up(max(N, 128), 128)
    steps = max(1, -(-Np128 // tn))
    # Keep >= 2 grid steps for moderately large tables so v7x megacore can
    # shard the entity axis across both TensorCores (no-op on v5e/v6e).
    if steps == 1 and Np128 >= 2048:
        steps = 2
    tn_eff = _round_up(-(-Np128 // steps), 128)
    Np = tn_eff * steps

    e_cat = jnp.concatenate([emb_e_real, emb_e_img], axis=1)    # (N, 2D)
    e_cat = jnp.pad(e_cat, ((0, Np - N), (0, 0)))
    e_cat_t = jnp.asarray(e_cat.T, dtype=table_dtype)           # (2D, Np)
    return e_cat_t, tn_eff


@functools.partial(jax.jit, static_argnames=("tn_eff",))
def complex_forward(e1_idx, rel_idx,
                    emb_e_real, emb_e_img, emb_rel_real, emb_rel_img,
                    e_cat_t, *, tn_eff):
    # ---- glue: embedding gathers (nn.Embedding + .squeeze()) ----
    e1_idx = e1_idx.reshape(-1)
    rel_idx = rel_idx.reshape(-1)
    e1r = emb_e_real[e1_idx]          # (B, D)
    e1i = emb_e_img[e1_idx]           # (B, D)
    rr = emb_rel_real[rel_idx]        # (B, D)
    ri = emb_rel_img[rel_idx]         # (B, D)

    # ---- hoisted complex coefficients (grid-invariant) ----
    #   pred = (e1r*rr - e1i*ri) @ Er^T + (e1r*ri + e1i*rr) @ Ei^T
    a = e1r * rr - e1i * ri
    b = e1r * ri + e1i * rr
    q = jnp.concatenate([a, b], axis=1)            # (B, 2D) fused query

    B, K = q.shape
    N = emb_e_real.shape[0]
    Np = e_cat_t.shape[1]
    assert Np % tn_eff == 0

    # Pad batch to the f32/bf16 sublane multiple; cast to the table dtype.
    Bp = _round_up(max(B, 8), 8)
    q = jnp.pad(q, ((0, Bp - B), (0, 0))).astype(e_cat_t.dtype)

    grid = (Np // tn_eff,)

    q_spec = pl.BlockSpec((Bp, K), lambda j: (0, 0))       # constant query block
    et_spec = pl.BlockSpec((K, tn_eff), lambda j: (0, j))  # walk entity tiles
    out_spec = pl.BlockSpec((Bp, tn_eff), lambda j: (0, j))

    # Explicit, generation-safe VMEM budget (v7x has only 64 MiB/TC).
    elt = jnp.dtype(e_cat_t.dtype).itemsize
    tile_bytes = elt * K * tn_eff + 4 * Bp * tn_eff + elt * Bp * K
    vmem_bytes = int(min(48 * 1024 * 1024,
                         max(32 * 1024 * 1024, 2 * tile_bytes + (4 << 20))))

    pred = pl.pallas_call(
        _complex_kernel,
        out_shape=jax.ShapeDtypeStruct((Bp, Np), jnp.float32),
        grid_spec=pltpu.PrefetchScalarGridSpec(
            num_scalar_prefetch=0,
            grid=grid,
            in_specs=[q_spec, et_spec],
            out_specs=out_spec,
        ),
        compiler_params=pltpu.CompilerParams(
            dimension_semantics=("parallel",),
            vmem_limit_bytes=vmem_bytes,
        ),
    )(q, e_cat_t)

    return pred[:B, :N]


def _xavier_normal(key, shape):
    fan_in, fan_out = shape[1], shape[0]
    std = (2.0 / (fan_in + fan_out)) ** 0.5
    return std * jax.random.normal(key, shape, dtype=jnp.float32)


if __name__ == "__main__":
    num_entities = 300        # deliberately not a multiple of 128 (padding path)
    num_relations = 64
    embedding_dim = 128
    batch = 8

    key = jax.random.PRNGKey(0)
    k1, k2, k3, k4, k5, k6 = jax.random.split(key, 6)

    # Deterministic xavier-normal-style init; padding_idx=0 row zeroed like nn.Embedding.
    def zero_pad_row(w):
        return w.at[0].set(0.0)

    emb_e_real = zero_pad_row(_xavier_normal(k1, (num_entities, embedding_dim)))
    emb_e_img = zero_pad_row(_xavier_normal(k2, (num_entities, embedding_dim)))
    emb_rel_real = zero_pad_row(_xavier_normal(k3, (num_relations, embedding_dim)))
    emb_rel_img = zero_pad_row(_xavier_normal(k4, (num_relations, embedding_dim)))

    e1 = jax.random.randint(k5, (batch,), 0, num_entities, dtype=jnp.int32)
    rel = jax.random.randint(k6, (batch,), 0, num_relations, dtype=jnp.int32)

    # One-time cached fused/transposed entity table (would live on the model).
    e_cat_t, tn_eff = prepare_complex_tables(emb_e_real, emb_e_img, tn=8192)
    e_cat_t = jax.block_until_ready(e_cat_t)

    pred = complex_forward(e1, rel,
                           emb_e_real, emb_e_img, emb_rel_real, emb_rel_img,
                           e_cat_t, tn_eff=tn_eff)
    jax.block_until_ready(pred)

    # Sanity check against a pure-JAX f32 reference of the PyTorch forward.
    e1r, e1i = emb_e_real[e1], emb_e_img[e1]
    rr, ri = emb_rel_real[rel], emb_rel_img[rel]
    ref = (
        (e1r * rr) @ emb_e_real.T
        + (e1r * ri) @ emb_e_img.T
        + (e1i * rr) @ emb_e_img.T
        - (e1i * ri) @ emb_e_real.T
    )
    ref = jax.nn.sigmoid(ref)
    assert pred.shape == (batch, num_entities)
    # bf16 table/query -> loosened tolerance on the sigmoid outputs.
    assert jnp.max(jnp.abs(pred - ref)) < 3e-3

    print("KERNEL_OK")
</pallas_src>

<mosaic_0001>
module attributes {stable_mosaic.version = 11 : i64} {
  func.func @_complex_kernel(%arg0: i32, %arg1: memref<8x256xbf16, #tpu.memory_space<vmem>>, %arg2: memref<256x384xbf16, #tpu.memory_space<vmem>>, %arg3: memref<8x384xf32, #tpu.memory_space<vmem>>) attributes {dimension_semantics = [#tpu.dimension_semantics<parallel>], iteration_bounds = array<i64: 1>, scalar_prefetch = 0 : i64, scratch_operands = 0 : i64, tpu.core_type = #tpu.core_type<tc>, window_params = [{pipeline_mode = #tpu.pipeline_mode<synchronous>, transform_indices = @transform_0, window_bounds = array<i64: 8, 256>}, {transform_indices = @transform_1, window_bounds = array<i64: 256, 384>}, {transform_indices = @transform_2, window_bounds = array<i64: 8, 384>}]} {
    %c0 = arith.constant 0 : index
    %c0_0 = arith.constant 0 : index
    %0 = vector.load %arg1[%c0, %c0_0] : memref<8x256xbf16, #tpu.memory_space<vmem>>, vector<8x256xbf16>
    %c0_1 = arith.constant 0 : index
    %c0_2 = arith.constant 0 : index
    %1 = vector.load %arg2[%c0_1, %c0_2] : memref<256x384xbf16, #tpu.memory_space<vmem>>, vector<256x384xbf16>
    %cst = arith.constant dense<0.000000e+00> : vector<8x384xf32>
    %2 = tpu.matmul %0, %1, %cst {dimension_numbers = #tpu.dot_dimension_numbers<[1], [0], [0], [1], [0, 0, 1, 1], [], []>} : vector<8x256xbf16>, vector<256x384xbf16>, vector<8x384xf32> -> vector<8x384xf32>
    %3 = arith.negf %2 : vector<8x384xf32>
    %4 = math.exp %3 : vector<8x384xf32>
    %cst_3 = arith.constant 1.000000e+00 : f32
    %5 = vector.broadcast %cst_3 : f32 to vector<8x384xf32>
    %6 = arith.addf %5, %4 : vector<8x384xf32>
    %7 = arith.divf %5, %6 : vector<8x384xf32>
    %c0_4 = arith.constant 0 : index
    %c0_5 = arith.constant 0 : index
    %8 = vector.load %arg3[%c0_4, %c0_5] : memref<8x384xf32, #tpu.memory_space<vmem>>, vector<8x384xf32>
    tpu.vector_store %arg3[%c0_4, %c0_5], %7 {strides = array<i32>} : memref<8x384xf32, #tpu.memory_space<vmem>>, vector<8x384xf32>,
    return
  }
  func.func @transform_0(%arg0: i32) -> (i32, i32) {
    %c0_i32 = arith.constant 0 : i32
    %c0_i32_0 = arith.constant 0 : i32
    %c0_i32_1 = arith.constant 0 : i32
    return %c0_i32, %c0_i32_0 : i32, i32
  }
  func.func @transform_1(%arg0: i32) -> (i32, i32) {
    %c0_i32 = arith.constant 0 : i32
    %c0_i32_0 = arith.constant 0 : i32
    return %c0_i32, %arg0 : i32, i32
  }
  func.func @transform_2(%arg0: i32) -> (i32, i32) {
    %c0_i32 = arith.constant 0 : i32
    %c0_i32_0 = arith.constant 0 : i32
    return %c0_i32, %arg0 : i32, i32
  }
}

</mosaic_0001>

<bundles_post_ra>
// kernel: complex_forward.1
= control target key start
LH: loop header
LB: loop body
LE: loop exit
PB: predicated region body
PF: predicated region fallthrough
CT: control target
= control target key end

     0   :  { %s810_s0 = inlined_call_operand.vmem [shape: bf16[8,256], index: 0, kind: input, shape index: {}]   ;;  %s811_s1 = inlined_call_operand.vmem [shape: bf16[256,384], index: 1, kind: input, shape index: {}]   ;;  %s812_s2 = inlined_call_operand.hbm [shape: f32[8,384], index: 2, kind: output, shape index: {}]  }
   0x1   :  { %v533_v0 = vld [vmem:[%s811_s1 + $0x4] ss:$12 sps:$4 sm:$0xff]   ;;  %v535_v1 = vld [vmem:[%s811_s1] ss:$12 sps:$4 sm:$0xff]   ;;  %v536_v2 = vld [vmem:[%s811_s1 + $0x1c] ss:$12 sps:$4 sm:$0xff]  }
   0x2   :  { %341 = vmatprep.subr.bf16.mxu0 %v533_v0  ;;  %v538_v3 = vld [vmem:[%s811_s1 + $0x18] ss:$12 sps:$4 sm:$0xff]   ;;  %v539_v4 = vld [vmem:[%s811_s1 + $0x34] ss:$12 sps:$4 sm:$0xff]   ;;  %v541_v5 = vld [vmem:[%s811_s1 + $0x30] ss:$12 sps:$4 sm:$0xff]  }
   0x3   :  { %342 = vmatpush1.bf16.msra.mxu0 %v535_v1  ;;  %v542_v6 = vld [vmem:[%s811_s1 + $0x4c] ss:$12 sps:$4 sm:$0xff]   ;;  %v554_v7 = vld [vmem:[%s811_s1 + $0xc8] ss:$12 sps:$4 sm:$0xff]   ;;  %v545_v9 = vld [vmem:[%s811_s1 + $0x64] ss:$12 sps:$4 sm:$0xff]  }
   0x4   :  { %343 = vmatprep.subr.bf16.mxu0 %v536_v2  ;;  %v544_v8 = vld [vmem:[%s811_s1 + $0x48] ss:$12 sps:$4 sm:$0xff]   ;;  %510 = vmatprep.subr.bf16.mxu1 %v554_v7  ;;  %v559_v11 = vld [vmem:[%s811_s1 + $0xe0] ss:$12 sps:$4 sm:$0xff]   ;;  %v564_v15 = vld [vmem:[%s811_s1 + $0xf8] ss:$12 sps:$4 sm:$0xff]  }
   0x5   :  { %v557_v10 = vld [vmem:[%s811_s1 + $0x8] ss:$12 sps:$4 sm:$0xff]   ;;  %v547_v12 = vld [vmem:[%s811_s1 + $0x60] ss:$12 sps:$4 sm:$0xff]   ;;  %v550_v16 = vld [vmem:[%s811_s1 + $0x78] ss:$12 sps:$4 sm:$0xff]  }
   0x6   :  { %511 = vmatpush3.bf16.msra.mxu1 %v557_v10  ;;  %v548_v13 = vld [vmem:[%s811_s1 + $0x7c] ss:$12 sps:$4 sm:$0xff]   ;;  %v562_v14 = vld [vmem:[%s811_s1 + $0x20] ss:$12 sps:$4 sm:$0xff]   ;;  %v567_v17 = vld [vmem:[%s811_s1 + $0x38] ss:$12 sps:$4 sm:$0xff]  }
   0x7   :  { %344 = vmatpush1.bf16.msra.mxu0 %v538_v3  ;;  %512 = vmatprep.subr.bf16.mxu1 %v559_v11  ;;  %v551_v18 = vld [vmem:[%s811_s1 + $0x94] ss:$12 sps:$4 sm:$0xff]   ;;  %v569_v19 = vld [vmem:[%s811_s1 + $0x110] ss:$12 sps:$4 sm:$0xff]   ;;  %v555_v23 = vld [vmem:[%s811_s1 + $0xac] ss:$12 sps:$4 sm:$0xff]  }
   0x8   :  { %345 = vmatprep.subr.bf16.mxu0 %v539_v4  ;;  %v553_v20 = vld [vmem:[%s811_s1 + $0x90] ss:$12 sps:$4 sm:$0xff]   ;;  %v574_v22 = vld [vmem:[%s811_s1 + $0x128] ss:$12 sps:$4 sm:$0xff]   ;;  %v579_v26 = vld [vmem:[%s811_s1 + $0x140] ss:$12 sps:$4 sm:$0xff]  }
   0x9   :  { %v572_v21 = vld [vmem:[%s811_s1 + $0x50] ss:$12 sps:$4 sm:$0xff]   ;;  %v558_v24 = vld [vmem:[%s811_s1 + $0xa8] ss:$12 sps:$4 sm:$0xff]   ;;  %v563_v28 = vld [vmem:[%s811_s1 + $0xc0] ss:$12 sps:$4 sm:$0xff]  }
   0xa   :  { %513 = vmatpush3.bf16.msra.mxu1 %v562_v14  ;;  %v577_v25 = vld [vmem:[%s811_s1 + $0x68] ss:$12 sps:$4 sm:$0xff]   ;;  %v560_v27 = vld [vmem:[%s811_s1 + $0xc4] ss:$12 sps:$4 sm:$0xff]   ;;  %v582_v29 = vld [vmem:[%s811_s1 + $0x80] ss:$12 sps:$4 sm:$0xff]  }
   0xb   :  { %346 = vmatpush1.bf16.msra.mxu0 %v541_v5  ;;  %514 = vmatprep.subr.bf16.mxu1 %v564_v15  ;;  %v584_v30 = vld [vmem:[%s811_s1 + $0x158] ss:$12 sps:$4 sm:$0xff]   ;;  %v565_v31 = vld [vmem:[%s811_s1 + $0xdc] ss:$12 sps:$4 sm:$0xff]   ;;  %v570_v34 = vld [vmem:[%s811_s1 + $0xf4] ss:$12 sps:$4 sm:$0xff]  }
   0xc   :  { %347 = vmatprep.subr.bf16.mxu0 %v542_v6  ;;  %v568_v32 = vld [vmem:[%s811_s1 + $0xd8] ss:$12 sps:$4 sm:$0xff]   ;;  %v589_v35 = vld [vmem:[%s811_s1 + $0x170] ss:$12 sps:$4 sm:$0xff]  }
   0xd   :  { %v587_v33 = vld [vmem:[%s811_s1 + $0x98] ss:$12 sps:$4 sm:$0xff]  }
   0xe   :  { %515 = vmatpush3.bf16.msra.mxu1 %v567_v17  ;;  %v13_v36 = vld [vmem:[%s810_s0] sm:$0xff] }
   0xf   :  { %348 = vmatpush1.bf16.msra.mxu0 %v544_v8  ;;  %516 = vmatprep.subr.bf16.mxu1 %v569_v19  ;;  %v458_v37 = vcombine.high %v13_v36, %v13_v36 }
  0x10   :  { %349 = vmatprep.subr.bf16.mxu0 %v545_v9 }
  0x12   :  { %517 = vmatpush3.bf16.msra.mxu1 %v572_v21 }
  0x13   :  { %350 = vmatpush1.bf16.msra.mxu0 %v547_v12  ;;  %518 = vmatprep.subr.bf16.mxu1 %v574_v22 }
  0x14   :  { %351 = vmatprep.subr.bf16.mxu0 %v548_v13 }
  0x16   :  { %519 = vmatpush3.bf16.msra.mxu1 %v577_v25 }
  0x17   :  { %352 = vmatpush1.bf16.msra.mxu0 %v550_v16  ;;  %520 = vmatprep.subr.bf16.mxu1 %v579_v26 }
  0x18   :  { %353 = vmatprep.subr.bf16.mxu0 %v551_v18 }
  0x1a   :  { %521 = vmatpush3.bf16.msra.mxu1 %v582_v29 }
  0x1b   :  { %354 = vmatpush1.bf16.msra.mxu0 %v553_v20  ;;  %522 = vmatprep.subr.bf16.mxu1 %v584_v30 }
  0x1c   :  { %355 = vmatprep.subr.bf16.mxu0 %v555_v23 }
  0x1f   :  { %356 = vmatpush1.bf16.msra.mxu0 %v558_v24 }
  0x20   :  { %357 = vmatprep.subr.bf16.mxu0 %v560_v27 }
  0x23   :  { %358 = vmatpush1.bf16.msra.mxu0 %v563_v28 }
  0x24   :  { %359 = vmatprep.subr.bf16.mxu0 %v565_v31 }
  0x25   :  { %7 = vsyncpa [#allocation3], 0  ;;  %523 = vmatpush3.bf16.msra.mxu1 %v587_v33  ;;  %v592_v38 = vld [vmem:[%s811_s1 + $0xb0] ss:$12 sps:$4 sm:$0xff]   ;;  %v575_v40 = vld [vmem:[%s811_s1 + $0x10c] ss:$12 sps:$4 sm:$0xff]   ;;  %414 = vmatprep.mubr.bf16.mxu1 %v458_v37  ;;  %v457_v41 = vcombine.low %v13_v36, %v13_v36 }
  0x26   :  { %v573_v39 = vld [vmem:[%s811_s1 + $0xf0] ss:$12 sps:$4 sm:$0xff]   ;;  %524 = vmatprep.subr.bf16.mxu1 %v589_v35  ;;  %373 = vmatprep.mubr.bf16.mxu0 %v458_v37  ;;  %v578_v42 = vld [vmem:[%s811_s1 + $0x108] ss:$12 sps:$4 sm:$0xff]   ;;  %v583_v44 = vld [vmem:[%s811_s1 + $0x120] ss:$12 sps:$4 sm:$0xff]  }
  0x27   :  { %360 = vmatpush1.bf16.msra.mxu0 %v568_v32  ;;  %v580_v43 = vld [vmem:[%s811_s1 + $0x124] ss:$12 sps:$4 sm:$0xff]   ;;  %v585_v45 = vld [vmem:[%s811_s1 + $0x13c] ss:$12 sps:$4 sm:$0xff]   ;;  %v590_v47 = vld [vmem:[%s811_s1 + $0x154] ss:$12 sps:$4 sm:$0xff]  }
  0x28   :  { %361 = vmatprep.subr.bf16.mxu0 %v570_v34  ;;  %v588_v46 = vld [vmem:[%s811_s1 + $0x138] ss:$12 sps:$4 sm:$0xff]   ;;  %v593_v48 = vld [vmem:[%s811_s1 + $0x150] ss:$12 sps:$4 sm:$0xff]   ;;  %v598_v50 = vld [vmem:[%s811_s1 + $0x168] ss:$12 sps:$4 sm:$0xff]  }
  0x29   :  { %525 = vmatpush3.bf16.msra.mxu1 %v592_v38  ;;  %v596_v49 = vld [vmem:[%s811_s1 + $0x16c] ss:$12 sps:$4 sm:$0xff]   ;;  %s635_s1 = smov [#allocation2]  }
  0x2a   :  { %s449_s22 = sshll.u32 %s635_s1, 4  ;;  %s450_s22 = int_to_ptr.vmem [resolvable:$true] %s449_s22 }
  0x2b   :  { %362 = vmatpush1.bf16.msra.mxu0 %v573_v39  ;;  %s611_s23 = scalar_lea.vmem %s450_s22, 384  ;;  %p616_p1 = scmp.lt.s32.totalorder %s450_s22, %s450_s22 }
  0x2c   :  { %363 = vmatprep.subr.bf16.mxu0 %v575_v40  ;;  %415 = vmatmul.mubr.bf16.vlgmr.msra.gmra.mrb[0].mxu1 %v457_v41  ;;  %p612_p0 = scmp.ne.s32.totalorder %s450_s22, %s611_s23  ;;  %p617_p2 = scmp.lt.s32.totalorder %s611_s23, %s611_s23 }
  0x2e   :  { %p618_p3 = por %p617_p2, %p616_p1 }
  0x2f   :  { %364 = vmatpush1.bf16.msra.mxu0 %v578_v42 }
  0x30   :  { %365 = vmatprep.subr.bf16.mxu0 %v580_v43  ;;  %p619_p4 = pnand %p618_p3, %p612_p0 }
  0x33   :  { %366 = vmatpush1.bf16.msra.mxu0 %v583_v44 }
  0x34   :  { %367 = vmatprep.subr.bf16.mxu0 %v585_v45 }
  0x37   :  { %368 = vmatpush1.bf16.msra.mxu0 %v588_v46 }
  0x38   :  { %369 = vmatprep.subr.bf16.mxu0 %v590_v47 }
  0x3b   :  { %370 = vmatpush1.bf16.msra.mxu0 %v593_v48 }
  0x3c   :  { %371 = vmatprep.subr.bf16.mxu0 %v596_v49 }
  0x3f   :  { %372 = vmatpush1.bf16.msra.mxu0 %v598_v50 }
  0x42   :  { %374 = vmatmul.mubr.bf16.vlgmr.msra.gmra.mrb[0].mxu0 %v457_v41 }
  0xff   :  { %v526_v51 = vpop.f32.mrb[0].mxu1 }
 0x100   :  { %v527_v52 = vpop.f32.mrb[1].mxu1 }
 0x101   :  { %v528_v53 = vadd.f32 %v527_v52, %v526_v51  ;;  %v529_v54 = vpop.f32.mrb[2].mxu1 }
 0x102   :  { %v530_v55 = vpop.f32.mrb[3].mxu1 }
 0x103   :  { %v509_v56 = vmul.f32 -1.442695, %v528_v53 }
 0x105   :  { %599 = vpow2.f32 %v509_v56 }
 0x10f   :  { %v600_v57 = vpop.eup %599 }
 0x110   :  { %v433_v58 = vadd.f32 1.0, %v600_v57 }
 0x112   :  { %601 = vrcp.f32 %v433_v58 }
 0x115   :  { %v375_v59 = vpop.f32.mrb[0].mxu0 }
 0x116   :  { %v507_v60 = vmul.f32 -1.442695, %v375_v59  ;;  %v377_v61 = vpop.f32.mrb[1].mxu0 }
 0x117   :  { %v508_v62 = vmul.f32 -1.442695, %v377_v61  ;;  %v379_v63 = vpop.f32.mrb[2].mxu0 }
 0x118   :  { %603 = vpow2.f32 %v507_v60  ;;  %v380_v0 = vpop.f32.mrb[3].mxu0 }
 0x119   :  { %605 = vpow2.f32 %v508_v62 }
 0x11c   :  { %v602_v1 = vpop.eup %601 }
 0x11d   :  { %442 = vst [vmem:[#allocation2 + $0x10] sm:$0xff] %v602_v1 }
 0x122   :  { %v604_v2 = vpop.eup %603 }
 0x123   :  { %v606_v3 = vpop.eup %605  ;;  %v431_v4 = vadd.f32 1.0, %v604_v2 }
 0x124   :  { %v432_v5 = vadd.f32 1.0, %v606_v3 }
 0x125   :  { %607 = vrcp.f32 %v431_v4 }
 0x126   :  { %609 = vrcp.f32 %v432_v5 }
 0x12f   :  { %v608_v6 = vpop.eup %607 }
 0x130   :  { %v610_v7 = vpop.eup %609  ;;  %440 = vst [vmem:[#allocation2] sm:$0xff] %v608_v6 }
 0x131   :  { %441 = vst [vmem:[#allocation2 + $0x8] sm:$0xff] %v610_v7 }
 0x132   :  { %622 = shalt.err (!%p619_p4)
}
 0x133   :  { %s623_s26 = scalar_lea.hbm %s812_s2, 384 }
 0x134   :  { %p624_p5 = scmp.ne.s32.totalorder %s812_s2, %s623_s26  ;;  %p627_p6 = scmp.lt.u32.totalorder %s623_s26, %s812_s2 }
 0x136   :  { %p629_p7 = pnand %p627_p6, %p624_p5 }
 0x138   :  { %632 = shalt.err (!%p629_p7)
}
 0x139   :  { %452 = dma.vmem_to_hbm [thread:$0]  %s450_s22, 384, %s812_s2, [#allocation3]  }
 0x13a   :  { %633 = dma.done.wait [#allocation3], 384  }
 0x13b   :  { %634 = vsyncadd [#allocation3], 4294966912 }
 0x13c   :  { %456 = vsyncpa [#allocation3], 1 }

</bundles_post_ra>
